<compile_context>
chip_gen: v6e
topology: v6e:2x2x1
jax: 0.10.0
libtpu: 0.0.40
codegen_flags: <defaults>
</compile_context>

<pallas_src>
import jax
import jax.numpy as jnp
from jax.experimental import pallas as pl
from jax.experimental.pallas import tpu as pltpu


def _model_fwd_kernel(f_ref, m_ref, b_ref, o_ref):
    """One batch tile: out = relu(f @ M + b), all instances folded into lanes.

    f_ref : (TB, IF)   features, batch on sublanes, inst*feats on lanes
    m_ref : (IF, IF)   block-diagonal Gram matrix, block i = W_i^T W_i
    b_ref : (1, IF)    flattened final bias
    o_ref : (TB, IF)   output
    """
    f = f_ref[...].astype(jnp.float32)
    m = m_ref[...].astype(jnp.float32)
    b = b_ref[...].astype(jnp.float32)
    out = jnp.dot(f, m, preferred_element_type=jnp.float32) + b
    o_ref[...] = jnp.maximum(out, 0.0).astype(o_ref.dtype)


def model_forward(features, W, b_final):
    """features: (batch, n_inst, n_feats); W: (n_inst, d_hidden, n_feats);
    b_final: (n_inst, n_feats). Returns (batch, n_inst, n_feats)."""
    batch, n_inst, n_feats = features.shape
    n_inst_w, d_hidden, n_feats_w = W.shape
    assert n_inst_w == n_inst and n_feats_w == n_feats
    assert b_final.shape == (n_inst, n_feats)

    IF = n_inst * n_feats

    # --- parameter-side precompute (tiny, done once in the wrapper) ---------
    # Per-instance Gram matrix G_i = W_i^T W_i, laid out block-diagonally so
    # the whole per-example computation is one (TB, IF) @ (IF, IF) dot.
    w32 = W.astype(jnp.float32)
    gram = jnp.einsum("idf,idg->ifg", w32, w32)                  # (I, F, F)
    eye = jnp.eye(n_inst, dtype=jnp.float32)
    M = jnp.einsum("ij,ifg->ifjg", eye, gram).reshape(IF, IF)    # block-diag
    b_flat = b_final.astype(jnp.float32).reshape(1, IF)

    # --- batch-side layout: free row-major reshape, no transposes -----------
    f_flat = features.reshape(batch, IF)

    # Grid sizing: one step per TensorCore is enough (memory/overhead bound).
    # Single step for small batches (covers v5e/v6e's single TC); two parallel
    # steps once the batch is big enough so v7x's two TCs each run one step.
    num_tiles = 2 if batch >= 256 else 1
    tile_b = pl.cdiv(batch, num_tiles)
    tile_b = pl.cdiv(tile_b, 8) * 8          # multiple of 8 sublanes
    padded_batch = tile_b * num_tiles
    if padded_batch != batch:
        f_flat = jnp.pad(f_flat, ((0, padded_batch - batch), (0, 0)))

    grid = (num_tiles,)

    out_flat = pl.pallas_call(
        _model_fwd_kernel,
        out_shape=jax.ShapeDtypeStruct((padded_batch, IF), features.dtype),
        grid_spec=pltpu.PrefetchScalarGridSpec(
            num_scalar_prefetch=0,
            grid=grid,
            in_specs=[
                # last dim equals the full array extent (IF) -> tiling rule ok;
                # tile_b is a multiple of 8 -> dense sublane stores.
                pl.BlockSpec((tile_b, IF), lambda ib: (ib, 0)),
                pl.BlockSpec((IF, IF), lambda ib: (0, 0)),
                pl.BlockSpec((1, IF), lambda ib: (0, 0)),
            ],
            out_specs=pl.BlockSpec((tile_b, IF), lambda ib: (ib, 0)),
        ),
        compiler_params=pltpu.CompilerParams(
            dimension_semantics=("parallel",),   # batch tiles are independent
        ),
    )(f_flat, M, b_flat)

    return out_flat[:batch].reshape(batch, n_inst, n_feats)


def _reference_forward(features, W, b_final):
    hidden = jnp.einsum("idf,bif->bid", W, features)
    out = jnp.einsum("idf,bid->bif", W, hidden) + b_final[None]
    return jnp.maximum(out, 0.0)


if __name__ == "__main__":
    # Config-like small shapes (Config defaults: n_features=5, d_hidden=2)
    n_inst, n_features, d_hidden = 4, 5, 2
    batch = 8

    key = jax.random.PRNGKey(0)
    k_w, k_x = jax.random.split(key)

    # Deterministic xavier_normal_-style init for W (n_inst, d_hidden, n_features)
    fan_in = d_hidden * n_features
    fan_out = n_inst * n_features
    std = (2.0 / (fan_in + fan_out)) ** 0.5
    W = std * jax.random.normal(k_w, (n_inst, d_hidden, n_features), dtype=jnp.float32)
    b_final = jnp.zeros((n_inst, n_features), dtype=jnp.float32)

    # Example input features (batch, inst, feats), like generate_batch output
    x = jax.random.uniform(k_x, (batch, n_inst, n_features), dtype=jnp.float32)

    out = model_forward(x, W, b_final)
    out = jax.block_until_ready(out)

    ref = _reference_forward(x, W, b_final)
    assert out.shape == (batch, n_inst, n_features)
    assert jnp.allclose(out, ref, atol=1e-5, rtol=1e-5)

    print("KERNEL_OK")
</pallas_src>

<mosaic_0001>
module attributes {stable_mosaic.version = 11 : i64} {
  func.func @_model_fwd_kernel(%arg0: i32, %arg1: memref<8x20xf32, #tpu.memory_space<vmem>>, %arg2: memref<20x20xf32, #tpu.memory_space<vmem>>, %arg3: memref<1x20xf32, #tpu.memory_space<vmem>>, %arg4: memref<8x20xf32, #tpu.memory_space<vmem>>) attributes {dimension_semantics = [#tpu.dimension_semantics<parallel>], iteration_bounds = array<i64: 1>, scalar_prefetch = 0 : i64, scratch_operands = 0 : i64, tpu.core_type = #tpu.core_type<tc>, window_params = [{transform_indices = @transform_0, window_bounds = array<i64: 8, 20>}, {pipeline_mode = #tpu.pipeline_mode<synchronous>, transform_indices = @transform_1, window_bounds = array<i64: 20, 20>}, {pipeline_mode = #tpu.pipeline_mode<synchronous>, transform_indices = @transform_2, window_bounds = array<i64: 1, 20>}, {transform_indices = @transform_3, window_bounds = array<i64: 8, 20>}]} {
    %c0 = arith.constant 0 : index
    %c0_0 = arith.constant 0 : index
    %0 = vector.load %arg1[%c0, %c0_0] : memref<8x20xf32, #tpu.memory_space<vmem>>, vector<8x20xf32>
    %c0_1 = arith.constant 0 : index
    %c0_2 = arith.constant 0 : index
    %1 = vector.load %arg2[%c0_1, %c0_2] : memref<20x20xf32, #tpu.memory_space<vmem>>, vector<20x20xf32>
    %c0_3 = arith.constant 0 : index
    %c0_4 = arith.constant 0 : index
    %2 = vector.load %arg3[%c0_3, %c0_4] : memref<1x20xf32, #tpu.memory_space<vmem>>, vector<1x20xf32>
    %cst = arith.constant dense<0.000000e+00> : vector<8x20xf32>
    %3 = tpu.matmul %0, %1, %cst {dimension_numbers = #tpu.dot_dimension_numbers<[1], [0], [0], [1], [0, 0, 1, 1], [], []>} : vector<8x20xf32>, vector<20x20xf32>, vector<8x20xf32> -> vector<8x20xf32>
    %4 = vector.broadcast %2 : vector<1x20xf32> to vector<8x20xf32>
    %5 = arith.addf %3, %4 : vector<8x20xf32>
    %cst_5 = arith.constant 0.000000e+00 : f32
    %6 = vector.broadcast %cst_5 : f32 to vector<8x20xf32>
    %7 = arith.maximumf %5, %6 : vector<8x20xf32>
    %c0_6 = arith.constant 0 : index
    %c0_7 = arith.constant 0 : index
    %8 = vector.load %arg4[%c0_6, %c0_7] : memref<8x20xf32, #tpu.memory_space<vmem>>, vector<8x20xf32>
    tpu.vector_store %arg4[%c0_6, %c0_7], %7 {strides = array<i32>} : memref<8x20xf32, #tpu.memory_space<vmem>>, vector<8x20xf32>,
    return
  }
  func.func @transform_0(%arg0: i32) -> (i32, i32) {
    %c0_i32 = arith.constant 0 : i32
    %c0_i32_0 = arith.constant 0 : i32
    return %arg0, %c0_i32 : i32, i32
  }
  func.func @transform_1(%arg0: i32) -> (i32, i32) {
    %c0_i32 = arith.constant 0 : i32
    %c0_i32_0 = arith.constant 0 : i32
    %c0_i32_1 = arith.constant 0 : i32
    return %c0_i32, %c0_i32_0 : i32, i32
  }
  func.func @transform_2(%arg0: i32) -> (i32, i32) {
    %c0_i32 = arith.constant 0 : i32
    %c0_i32_0 = arith.constant 0 : i32
    %c0_i32_1 = arith.constant 0 : i32
    return %c0_i32, %c0_i32_0 : i32, i32
  }
  func.func @transform_3(%arg0: i32) -> (i32, i32) {
    %c0_i32 = arith.constant 0 : i32
    %c0_i32_0 = arith.constant 0 : i32
    return %arg0, %c0_i32 : i32, i32
  }
}

</mosaic_0001>

<bundles_post_ra>
// kernel: tpu_custom_call.1
= control target key start
LH: loop header
LB: loop body
LE: loop exit
PB: predicated region body
PF: predicated region fallthrough
CT: control target
= control target key end

     0   :  { %8 = vsyncpa [#allocation3], 0  ;;  %s276_s0 = inlined_call_operand.hbm [shape: f32[8,20], index: 0, kind: input, shape index: {}]   ;;  %s277_s1 = inlined_call_operand.hbm [shape: f32[20,20], index: 1, kind: input, shape index: {}]   ;;  %s278_s2 = inlined_call_operand.vmem [shape: f32[1,20], index: 2, kind: input, shape index: {}]   ;;  %s279_s3 = inlined_call_operand.hbm [shape: f32[8,20], index: 3, kind: output, shape index: {}]  }
   0x1   :  { %9 = vsyncpa [#allocation6], 0 }
   0x2   :  { %10 = vsyncpa [#allocation4], 0  ;;  %s237_s12 = smov [#allocation2]   ;;  %s238_s14 = smov [#allocation5]  }
   0x3   :  { %s17_s13 = sshll.u32 %s237_s12, 4  ;;  %s26_s15 = sshll.u32 %s238_s14, 4  ;;  %s18_s13 = int_to_ptr.vmem [resolvable:$true] %s17_s13  ;;  %s27_s15 = int_to_ptr.vmem [resolvable:$true] %s26_s15 }
   0x4   :  { %s179_s16 = scalar_lea.vmem %s18_s13, 128  ;;  %p184_p1 = scmp.lt.s32.totalorder %s18_s13, %s18_s13 }
   0x5   :  { %p180_p0 = scmp.ne.s32.totalorder %s18_s13, %s179_s16  ;;  %p185_p2 = scmp.lt.s32.totalorder %s179_s16, %s179_s16 }
   0x7   :  { %p186_p3 = por %p185_p2, %p184_p1 }
   0x9   :  { %p187_p4 = pnand %p186_p3, %p180_p0 }
   0xb   :  { %190 = shalt.err (!%p187_p4)
}
   0xc   :  { %20 = dma.hbm_to_vmem [thread:$0]  %s276_s0, 128, %s18_s13, [#allocation3]  }
   0xd   :  { %s199_s19 = scalar_lea.vmem %s27_s15, 384  ;;  %p204_p6 = scmp.lt.s32.totalorder %s27_s15, %s27_s15 }
   0xe   :  { %p200_p5 = scmp.ne.s32.totalorder %s27_s15, %s199_s19  ;;  %p205_p7 = scmp.lt.s32.totalorder %s199_s19, %s199_s19 }
  0x10   :  { %p206_p8 = por %p205_p7, %p204_p6 }
  0x12   :  { %p207_p9 = pnand %p206_p8, %p200_p5 }
  0x14   :  { %210 = shalt.err (!%p207_p9)
}
  0x15   :  { %s239_s20 = smov 128   ;;  %s240_s21 = smov 8  }
  0x16   :  { %32 = dma.hbm_to_vmem [thread:$0]  %s277_s1, 384, %s27_s15, [#allocation6], %s239_s20, %s239_s20, %s240_s21  }
  0x17   :  { %231 = dma.done.wait [#allocation3], 128  }
  0x18   :  { %232 = vsyncadd [#allocation3], 4294967168 }
  0x19   :  { %233 = dma.done.wait [#allocation6], 384  }
  0x1a   :  { %234 = vsyncadd [#allocation6], 4294966912  ;;  %v241_v0 = vmov 0.0   ;;  %vm242_vm0 = vmmov 0   ;;  %vm56_vm1 = vcmask 1043456   ;;  %v43_v2 = vld [vmem:[#allocation5 + $0x8] sm:$0xff] }
  0x1b   :  { %155 = vmatprep.subr.mxu0 %v241_v0  ;;  %161 = vmatprep.mubr.msk.f32.mxu0 %vm242_vm0, %v241_v0  ;;  %v44_v1 = vld [vmem:[#allocation5 + $0x10] sm:$0xf]  ;;  %v42_v3 = vld [vmem:[#allocation5] sm:$0xff]  ;;  %v41_v4 = vld [vmem:[#allocation2] sm:$0xff]  ;;  %vm52_vm2 = vcmask 162816   ;;  %s243_s24 = smov [#allocation7]  }
  0x1c   :  { %156 = vmatpush3.msk.msra.mxu0 %vm56_vm1, %v44_v1  ;;  %v148_v5 = vld [vmem:[%s278_s2] ss:$0 sm:$0xff]  ;;  %s138_s25 = sshll.u32 %s243_s24, 4  ;;  %s139_s25 = int_to_ptr.vmem [resolvable:$true] %s138_s25 }
  0x1d   :  { %157 = vmatprep.subr.mxu0 %v241_v0  ;;  %s211_s26 = scalar_lea.vmem %s139_s25, 128  ;;  %p216_p11 = scmp.lt.s32.totalorder %s139_s25, %s139_s25 }
  0x1e   :  { %158 = vmatpush3.msra.mxu0 %v43_v2  ;;  %p212_p10 = scmp.ne.s32.totalorder %s139_s25, %s211_s26  ;;  %p217_p12 = scmp.lt.s32.totalorder %s211_s26, %s211_s26 }
  0x1f   :  { %159 = vmatprep.subr.mxu0 %v241_v0 }
  0x20   :  { %160 = vmatpush3.msra.mxu0 %v42_v3  ;;  %p218_p13 = por %p217_p12, %p216_p11 }
  0x21   :  { %162 = vmatmul.mubr.msk.f32.vlgmr.msra.gmra.mxu0 %vm52_vm2, %v41_v4 }
  0x22   :  { %p219_p0 = pnand %p218_p13, %p212_p10 }
  0xe1   :  { %v126_v6 = vpop.f32.mrf.mxu0 }
  0xe2   :  { %v127_v7 = vadd.f32 %v148_v5, %v126_v6 }
  0xe3   :  { %v163_v8 = vpop.f32.mrf.mxu0 }
  0xe4   :  { %v130_v9 = vmax.f32 %v127_v7, 0.0 }
  0xe6   :  { %131 = vst.msk [vmem:[#allocation7] sm:$0xff] %vm52_vm2, %v130_v9 }
  0xe7   :  { %222 = shalt.err (!%p219_p0)
}
  0xe8   :  { %141 = dma.vmem_to_hbm [thread:$0]  %s139_s25, 128, %s279_s3, [#allocation4]  }
  0xe9   :  { %235 = dma.done.wait [#allocation4], 128  }
  0xea   :  { %236 = vsyncadd [#allocation4], 4294967168 }
  0xeb   :  { %145 = vsyncpa [#allocation3], 1 }
  0xec   :  { %146 = vsyncpa [#allocation6], 1 }
  0xed   :  { %147 = vsyncpa [#allocation4], 1 }

</bundles_post_ra>
